<compile_context>
chip_gen: v5e
topology: v5e:2x2
jax: 0.10.0
libtpu: 0.0.40
codegen_flags: <defaults>
</compile_context>

<pallas_src>
import functools
import math

import jax
import jax.numpy as jnp
from jax.experimental import pallas as pl
from jax.experimental.pallas import tpu as pltpu


def _multi_head_kernel(xq_ref, xk_ref, xv_ref,
                       wq_ref, bq_ref, wk_ref, bk_ref, wv_ref, bv_ref,
                       wo_ref, bo_ref, o_ref,
                       *, n_heads: int, d_head_k: int, d_head_v: int,
                       sm_scale: float):
    # xq_ref: (1, TQ, Dk)   xk_ref: (1, Sk, Dk)   xv_ref: (1, Sk, Dv)
    # wq/wk: (Dk, Dk)  wv: (Dv, Dv)  wo: (Dv, Dk)  biases: (1, D)
    xq = xq_ref[0]                       # (TQ, Dk)
    xk = xk_ref[0]                       # (Sk, Dk)
    xv = xv_ref[0]                       # (Sk, Dv)

    # Full projections once per tile (MXU; native-dtype operands, f32 accumulate).
    q_all = jnp.dot(xq, wq_ref[...], preferred_element_type=jnp.float32) + bq_ref[...]
    k_all = jnp.dot(xk, wk_ref[...], preferred_element_type=jnp.float32) + bk_ref[...]
    v_all = jnp.dot(xv, wv_ref[...], preferred_element_type=jnp.float32) + bv_ref[...]

    tq = xq.shape[0]
    d_out = wo_ref.shape[1]
    acc = jnp.zeros((tq, d_out), jnp.float32)

    # Static unroll over heads (n_heads is small); each head's context is folded
    # straight into the Wo projection via its row-slice of Wo, so the only store
    # per tile is the lane-dense (TQ, d_key) output.
    for h in range(n_heads):
        q = q_all[:, h * d_head_k:(h + 1) * d_head_k]       # (TQ, dh)
        k = k_all[:, h * d_head_k:(h + 1) * d_head_k]       # (Sk, dh)
        v = v_all[:, h * d_head_v:(h + 1) * d_head_v]       # (Sk, dhv)

        # scores = q @ k^T / sqrt(d_head)
        s = jax.lax.dot_general(q, k, (((1,), (1,)), ((), ())),
                                preferred_element_type=jnp.float32) * sm_scale

        # Row-wise softmax: max-subtract, exp (EUP), one reciprocal per row
        # (EUP) + multiply instead of a per-element divide.
        m = jnp.max(s, axis=-1, keepdims=True)
        p = jnp.exp(s - m)
        denom = jnp.sum(p, axis=-1, keepdims=True)
        # approx=True would be faster but loosens accuracy below the 1e-3 check.
        p = p * pl.reciprocal(denom, approx=False)

        ctx = jnp.dot(p, v, preferred_element_type=jnp.float32)          # (TQ, dhv)
        acc = acc + jnp.dot(ctx, wo_ref[h * d_head_v:(h + 1) * d_head_v, :],
                            preferred_element_type=jnp.float32)

    o_ref[0] = (acc + bo_ref[...]).astype(o_ref.dtype)


def multi_head(xq, xk, xv, wq, bq, wk, bk, wv, bv, wo, bo, *, n_heads, tq=None):
    """Multi-head attention.  Weights are in `y = x @ W + b` layout
    (i.e. the transpose of torch.nn.Linear.weight)."""
    B, Sq, Dk = xq.shape
    Bk, Sk, Dk2 = xk.shape
    Bv, Sv, Dv = xv.shape
    assert (Bk, Bv) == (B, B) and Dk2 == Dk and Sv == Sk
    assert Dk % n_heads == 0 and Dv % n_heads == 0
    d_head_k = Dk // n_heads
    d_head_v = Dv // n_heads

    if tq is None:
        # Multiple of 8; keeps per-step VMEM modest even on v7x (64 MiB).
        tq = Sq if Sq <= 256 else 256
    nq = pl.cdiv(Sq, tq)

    bq2, bk2, bv2, bo2 = (x.reshape(1, -1) for x in (bq, bk, bv, bo))

    kernel = functools.partial(
        _multi_head_kernel,
        n_heads=n_heads, d_head_k=d_head_k, d_head_v=d_head_v,
        sm_scale=1.0 / math.sqrt(d_head_k))

    flops = (2 * B * (Sq * Dk * Dk + Sk * Dk * Dk + Sk * Dv * Dv + Sq * Dv * Dk)
             + 2 * B * n_heads * Sq * Sk * (d_head_k + d_head_v))
    transcendentals = B * n_heads * Sq * (Sk + 1)      # exp per score + recip per row
    bytes_accessed = 4 * (2 * B * Sq * Dk + B * Sk * Dk + B * Sk * Dv
                          + 2 * Dk * Dk + Dv * Dv + Dv * Dk + 3 * Dk + Dv)

    out = pl.pallas_call(
        kernel,
        out_shape=jax.ShapeDtypeStruct((B, Sq, Dk), xq.dtype),
        grid=(B, nq),
        in_specs=[
            pl.BlockSpec((1, tq, Dk), lambda b, qi: (b, qi, 0)),   # queries (row-tiled)
            pl.BlockSpec((1, Sk, Dk), lambda b, qi: (b, 0, 0)),    # keys (full seq)
            pl.BlockSpec((1, Sk, Dv), lambda b, qi: (b, 0, 0)),    # values (full seq)
            pl.BlockSpec((Dk, Dk), lambda b, qi: (0, 0)),          # Wq (VMEM-resident)
            pl.BlockSpec((1, Dk), lambda b, qi: (0, 0)),           # bq
            pl.BlockSpec((Dk, Dk), lambda b, qi: (0, 0)),          # Wk
            pl.BlockSpec((1, Dk), lambda b, qi: (0, 0)),           # bk
            pl.BlockSpec((Dv, Dv), lambda b, qi: (0, 0)),          # Wv
            pl.BlockSpec((1, Dv), lambda b, qi: (0, 0)),           # bv
            pl.BlockSpec((Dv, Dk), lambda b, qi: (0, 0)),          # Wo (VMEM-resident)
            pl.BlockSpec((1, Dk), lambda b, qi: (0, 0)),           # bo
        ],
        out_specs=pl.BlockSpec((1, tq, Dk), lambda b, qi: (b, qi, 0)),
        compiler_params=pltpu.CompilerParams(
            dimension_semantics=("parallel", "parallel")),
        cost_estimate=pl.CostEstimate(
            flops=flops, transcendentals=transcendentals,
            bytes_accessed=bytes_accessed),
    )(xq, xk, xv, wq, bq2, wk, bk2, wv, bv2, wo, bo2)
    return out


def _reference(xq, xk, xv, wq, bq, wk, bk, wv, bv, wo, bo, n_heads):
    q = xq @ wq + bq
    k = xk @ wk + bk
    v = xv @ wv + bv
    B, Sq, Dk = q.shape
    Sk = k.shape[1]
    Dv = v.shape[-1]
    dh, dhv = Dk // n_heads, Dv // n_heads
    qh = q.reshape(B, Sq, n_heads, dh).transpose(0, 2, 1, 3)
    kh = k.reshape(B, Sk, n_heads, dh).transpose(0, 2, 1, 3)
    vh = v.reshape(B, Sk, n_heads, dhv).transpose(0, 2, 1, 3)
    s = jnp.einsum("bhqd,bhkd->bhqk", qh, kh) / math.sqrt(dh)
    p = jax.nn.softmax(s, axis=-1)
    ctx = jnp.einsum("bhqk,bhkd->bhqd", p, vh)
    ctx = ctx.transpose(0, 2, 1, 3).reshape(B, Sq, Dv)
    return ctx @ wo + bo


if __name__ == "__main__":
    B, Sq, Sk, Dk, Dv, H = 2, 8, 8, 32, 32, 4
    key = jax.random.PRNGKey(0)
    ks = jax.random.split(key, 11)

    xq = jax.random.normal(ks[0], (B, Sq, Dk), dtype=jnp.float32)
    xk = jax.random.normal(ks[1], (B, Sk, Dk), dtype=jnp.float32)
    xv = jax.random.normal(ks[2], (B, Sk, Dv), dtype=jnp.float32)

    # nn.Linear params in "y = x @ W + b" layout.
    wq = jax.random.normal(ks[3], (Dk, Dk), dtype=jnp.float32) / Dk ** 0.5
    bq = jax.random.normal(ks[4], (Dk,), dtype=jnp.float32) * 0.01
    wk = jax.random.normal(ks[5], (Dk, Dk), dtype=jnp.float32) / Dk ** 0.5
    bk = jax.random.normal(ks[6], (Dk,), dtype=jnp.float32) * 0.01
    wv = jax.random.normal(ks[7], (Dv, Dv), dtype=jnp.float32) / Dv ** 0.5
    bv = jax.random.normal(ks[8], (Dv,), dtype=jnp.float32) * 0.01
    wo = jax.random.normal(ks[9], (Dv, Dk), dtype=jnp.float32) / Dv ** 0.5
    bo = jax.random.normal(ks[10], (Dk,), dtype=jnp.float32) * 0.01

    out = multi_head(xq, xk, xv, wq, bq, wk, bk, wv, bv, wo, bo, n_heads=H)
    out = jax.block_until_ready(out)

    ref = _reference(xq, xk, xv, wq, bq, wk, bk, wv, bv, wo, bo, H)
    assert out.shape == (B, Sq, Dk)
    # Tolerance covers f32-matmul pass-decomposition differences between the
    # Mosaic kernel and the XLA reference path on the MXU.
    assert jnp.allclose(out, ref, atol=1e-3, rtol=1e-3), "mismatch vs reference"
    print("KERNEL_OK")
</pallas_src>

<mosaic_0001>
module attributes {stable_mosaic.version = 11 : i64} {
  func.func @_multi_head_kernel(%arg0: i32, %arg1: i32, %arg2: memref<1x8x32xf32, #tpu.memory_space<vmem>>, %arg3: memref<1x8x32xf32, #tpu.memory_space<vmem>>, %arg4: memref<1x8x32xf32, #tpu.memory_space<vmem>>, %arg5: memref<32x32xf32, #tpu.memory_space<vmem>>, %arg6: memref<1x32xf32, #tpu.memory_space<vmem>>, %arg7: memref<32x32xf32, #tpu.memory_space<vmem>>, %arg8: memref<1x32xf32, #tpu.memory_space<vmem>>, %arg9: memref<32x32xf32, #tpu.memory_space<vmem>>, %arg10: memref<1x32xf32, #tpu.memory_space<vmem>>, %arg11: memref<32x32xf32, #tpu.memory_space<vmem>>, %arg12: memref<1x32xf32, #tpu.memory_space<vmem>>, %arg13: memref<1x8x32xf32, #tpu.memory_space<vmem>>) attributes {dimension_semantics = [#tpu.dimension_semantics<parallel>, #tpu.dimension_semantics<parallel>], iteration_bounds = array<i64: 2, 1>, scalar_prefetch = 0 : i64, scratch_operands = 0 : i64, tpu.core_type = #tpu.core_type<tc>, window_params = [{transform_indices = @transform_0, window_bounds = array<i64: 1, 8, 32>}, {transform_indices = @transform_1, window_bounds = array<i64: 1, 8, 32>}, {transform_indices = @transform_2, window_bounds = array<i64: 1, 8, 32>}, {pipeline_mode = #tpu.pipeline_mode<synchronous>, transform_indices = @transform_3, window_bounds = array<i64: 32, 32>}, {pipeline_mode = #tpu.pipeline_mode<synchronous>, transform_indices = @transform_4, window_bounds = array<i64: 1, 32>}, {pipeline_mode = #tpu.pipeline_mode<synchronous>, transform_indices = @transform_5, window_bounds = array<i64: 32, 32>}, {pipeline_mode = #tpu.pipeline_mode<synchronous>, transform_indices = @transform_6, window_bounds = array<i64: 1, 32>}, {pipeline_mode = #tpu.pipeline_mode<synchronous>, transform_indices = @transform_7, window_bounds = array<i64: 32, 32>}, {pipeline_mode = #tpu.pipeline_mode<synchronous>, transform_indices = @transform_8, window_bounds = array<i64: 1, 32>}, {pipeline_mode = #tpu.pipeline_mode<synchronous>, transform_indices = @transform_9, window_bounds = array<i64: 32, 32>}, {pipeline_mode = #tpu.pipeline_mode<synchronous>, transform_indices = @transform_10, window_bounds = array<i64: 1, 32>}, {transform_indices = @transform_11, window_bounds = array<i64: 1, 8, 32>}]} {
    %c0 = arith.constant 0 : index
    %c0_0 = arith.constant 0 : index
    %c0_1 = arith.constant 0 : index
    %0 = vector.load %arg2[%c0, %c0_0, %c0_1] : memref<1x8x32xf32, #tpu.memory_space<vmem>>, vector<1x8x32xf32>
    %1 = vector.shape_cast %0 : vector<1x8x32xf32> to vector<8x32xf32>
    %c0_2 = arith.constant 0 : index
    %c0_3 = arith.constant 0 : index
    %c0_4 = arith.constant 0 : index
    %2 = vector.load %arg3[%c0_2, %c0_3, %c0_4] : memref<1x8x32xf32, #tpu.memory_space<vmem>>, vector<1x8x32xf32>
    %3 = vector.shape_cast %2 : vector<1x8x32xf32> to vector<8x32xf32>
    %c0_5 = arith.constant 0 : index
    %c0_6 = arith.constant 0 : index
    %c0_7 = arith.constant 0 : index
    %4 = vector.load %arg4[%c0_5, %c0_6, %c0_7] : memref<1x8x32xf32, #tpu.memory_space<vmem>>, vector<1x8x32xf32>
    %5 = vector.shape_cast %4 : vector<1x8x32xf32> to vector<8x32xf32>
    %c0_8 = arith.constant 0 : index
    %c0_9 = arith.constant 0 : index
    %6 = vector.load %arg5[%c0_8, %c0_9] : memref<32x32xf32, #tpu.memory_space<vmem>>, vector<32x32xf32>
    %cst = arith.constant dense<0.000000e+00> : vector<8x32xf32>
    %7 = tpu.matmul %1, %6, %cst {dimension_numbers = #tpu.dot_dimension_numbers<[1], [0], [0], [1], [0, 0, 1, 1], [], []>} : vector<8x32xf32>, vector<32x32xf32>, vector<8x32xf32> -> vector<8x32xf32>
    %c0_10 = arith.constant 0 : index
    %c0_11 = arith.constant 0 : index
    %8 = vector.load %arg6[%c0_10, %c0_11] : memref<1x32xf32, #tpu.memory_space<vmem>>, vector<1x32xf32>
    %9 = vector.broadcast %8 : vector<1x32xf32> to vector<8x32xf32>
    %10 = arith.addf %7, %9 : vector<8x32xf32>
    %c0_12 = arith.constant 0 : index
    %c0_13 = arith.constant 0 : index
    %11 = vector.load %arg7[%c0_12, %c0_13] : memref<32x32xf32, #tpu.memory_space<vmem>>, vector<32x32xf32>
    %cst_14 = arith.constant dense<0.000000e+00> : vector<8x32xf32>
    %12 = tpu.matmul %3, %11, %cst_14 {dimension_numbers = #tpu.dot_dimension_numbers<[1], [0], [0], [1], [0, 0, 1, 1], [], []>} : vector<8x32xf32>, vector<32x32xf32>, vector<8x32xf32> -> vector<8x32xf32>
    %c0_15 = arith.constant 0 : index
    %c0_16 = arith.constant 0 : index
    %13 = vector.load %arg8[%c0_15, %c0_16] : memref<1x32xf32, #tpu.memory_space<vmem>>, vector<1x32xf32>
    %14 = vector.broadcast %13 : vector<1x32xf32> to vector<8x32xf32>
    %15 = arith.addf %12, %14 : vector<8x32xf32>
    %c0_17 = arith.constant 0 : index
    %c0_18 = arith.constant 0 : index
    %16 = vector.load %arg9[%c0_17, %c0_18] : memref<32x32xf32, #tpu.memory_space<vmem>>, vector<32x32xf32>
    %cst_19 = arith.constant dense<0.000000e+00> : vector<8x32xf32>
    %17 = tpu.matmul %5, %16, %cst_19 {dimension_numbers = #tpu.dot_dimension_numbers<[1], [0], [0], [1], [0, 0, 1, 1], [], []>} : vector<8x32xf32>, vector<32x32xf32>, vector<8x32xf32> -> vector<8x32xf32>
    %c0_20 = arith.constant 0 : index
    %c0_21 = arith.constant 0 : index
    %18 = vector.load %arg10[%c0_20, %c0_21] : memref<1x32xf32, #tpu.memory_space<vmem>>, vector<1x32xf32>
    %19 = vector.broadcast %18 : vector<1x32xf32> to vector<8x32xf32>
    %20 = arith.addf %17, %19 : vector<8x32xf32>
    %cst_22 = arith.constant 0.000000e+00 : f32
    %21 = vector.broadcast %cst_22 : f32 to vector<8x32xf32>
    %22 = vector.extract_strided_slice %10 {offsets = [0, 0], sizes = [8, 8], strides = [1, 1]} : vector<8x32xf32> to vector<8x8xf32>
    %23 = vector.extract_strided_slice %15 {offsets = [0, 0], sizes = [8, 8], strides = [1, 1]} : vector<8x32xf32> to vector<8x8xf32>
    %24 = vector.extract_strided_slice %20 {offsets = [0, 0], sizes = [8, 8], strides = [1, 1]} : vector<8x32xf32> to vector<8x8xf32>
    %cst_23 = arith.constant dense<0.000000e+00> : vector<8x8xf32>
    %25 = tpu.matmul %22, %23, %cst_23 {dimension_numbers = #tpu.dot_dimension_numbers<[1], [1], [0], [0], [0, 0, 1, 0], [], []>} : vector<8x8xf32>, vector<8x8xf32>, vector<8x8xf32> -> vector<8x8xf32>
    %cst_24 = arith.constant 0.353553385 : f32
    %26 = vector.broadcast %cst_24 : f32 to vector<8x8xf32>
    %27 = arith.mulf %25, %26 : vector<8x8xf32>
    %cst_25 = arith.constant dense<0xFF800000> : vector<8xf32>
    %28 = vector.multi_reduction <maximumf>, %27, %cst_25 [1] : vector<8x8xf32> to vector<8xf32>
    %29 = vector.shape_cast %28 : vector<8xf32> to vector<8x1xf32>
    %30 = vector.broadcast %29 : vector<8x1xf32> to vector<8x8xf32>
    %31 = arith.subf %27, %30 : vector<8x8xf32>
    %32 = math.exp %31 : vector<8x8xf32>
    %cst_26 = arith.constant dense<0.000000e+00> : vector<8xf32>
    %33 = vector.multi_reduction <add>, %32, %cst_26 [1] : vector<8x8xf32> to vector<8xf32>
    %34 = vector.shape_cast %33 : vector<8xf32> to vector<8x1xf32>
    %35 = tpu.reciprocal %34 : vector<8x1xf32> -> vector<8x1xf32>
    %36 = vector.broadcast %35 : vector<8x1xf32> to vector<8x8xf32>
    %37 = arith.mulf %32, %36 : vector<8x8xf32>
    %cst_27 = arith.constant dense<0.000000e+00> : vector<8x8xf32>
    %38 = tpu.matmul %37, %24, %cst_27 {dimension_numbers = #tpu.dot_dimension_numbers<[1], [0], [0], [1], [0, 0, 1, 1], [], []>} : vector<8x8xf32>, vector<8x8xf32>, vector<8x8xf32> -> vector<8x8xf32>
    %c0_28 = arith.constant 0 : index
    %c0_29 = arith.constant 0 : index
    %39 = vector.load %arg11[%c0_28, %c0_29] : memref<32x32xf32, #tpu.memory_space<vmem>>, vector<8x32xf32>
    %cst_30 = arith.constant dense<0.000000e+00> : vector<8x32xf32>
    %40 = tpu.matmul %38, %39, %cst_30 {dimension_numbers = #tpu.dot_dimension_numbers<[1], [0], [0], [1], [0, 0, 1, 1], [], []>} : vector<8x8xf32>, vector<8x32xf32>, vector<8x32xf32> -> vector<8x32xf32>
    %41 = arith.addf %21, %40 : vector<8x32xf32>
    %42 = vector.extract_strided_slice %10 {offsets = [0, 8], sizes = [8, 8], strides = [1, 1]} : vector<8x32xf32> to vector<8x8xf32>
    %43 = vector.extract_strided_slice %15 {offsets = [0, 8], sizes = [8, 8], strides = [1, 1]} : vector<8x32xf32> to vector<8x8xf32>
    %44 = vector.extract_strided_slice %20 {offsets = [0, 8], sizes = [8, 8], strides = [1, 1]} : vector<8x32xf32> to vector<8x8xf32>
    %cst_31 = arith.constant dense<0.000000e+00> : vector<8x8xf32>
    %45 = tpu.matmul %42, %43, %cst_31 {dimension_numbers = #tpu.dot_dimension_numbers<[1], [1], [0], [0], [0, 0, 1, 0], [], []>} : vector<8x8xf32>, vector<8x8xf32>, vector<8x8xf32> -> vector<8x8xf32>
    %cst_32 = arith.constant 0.353553385 : f32
    %46 = vector.broadcast %cst_32 : f32 to vector<8x8xf32>
    %47 = arith.mulf %45, %46 : vector<8x8xf32>
    %cst_33 = arith.constant dense<0xFF800000> : vector<8xf32>
    %48 = vector.multi_reduction <maximumf>, %47, %cst_33 [1] : vector<8x8xf32> to vector<8xf32>
    %49 = vector.shape_cast %48 : vector<8xf32> to vector<8x1xf32>
    %50 = vector.broadcast %49 : vector<8x1xf32> to vector<8x8xf32>
    %51 = arith.subf %47, %50 : vector<8x8xf32>
    %52 = math.exp %51 : vector<8x8xf32>
    %cst_34 = arith.constant dense<0.000000e+00> : vector<8xf32>
    %53 = vector.multi_reduction <add>, %52, %cst_34 [1] : vector<8x8xf32> to vector<8xf32>
    %54 = vector.shape_cast %53 : vector<8xf32> to vector<8x1xf32>
    %55 = tpu.reciprocal %54 : vector<8x1xf32> -> vector<8x1xf32>
    %56 = vector.broadcast %55 : vector<8x1xf32> to vector<8x8xf32>
    %57 = arith.mulf %52, %56 : vector<8x8xf32>
    %cst_35 = arith.constant dense<0.000000e+00> : vector<8x8xf32>
    %58 = tpu.matmul %57, %44, %cst_35 {dimension_numbers = #tpu.dot_dimension_numbers<[1], [0], [0], [1], [0, 0, 1, 1], [], []>} : vector<8x8xf32>, vector<8x8xf32>, vector<8x8xf32> -> vector<8x8xf32>
    %c8 = arith.constant 8 : index
    %c0_36 = arith.constant 0 : index
    %59 = vector.load %arg11[%c8, %c0_36] : memref<32x32xf32, #tpu.memory_space<vmem>>, vector<8x32xf32>
    %cst_37 = arith.constant dense<0.000000e+00> : vector<8x32xf32>
    %60 = tpu.matmul %58, %59, %cst_37 {dimension_numbers = #tpu.dot_dimension_numbers<[1], [0], [0], [1], [0, 0, 1, 1], [], []>} : vector<8x8xf32>, vector<8x32xf32>, vector<8x32xf32> -> vector<8x32xf32>
    %61 = arith.addf %41, %60 : vector<8x32xf32>
    %62 = vector.extract_strided_slice %10 {offsets = [0, 16], sizes = [8, 8], strides = [1, 1]} : vector<8x32xf32> to vector<8x8xf32>
    %63 = vector.extract_strided_slice %15 {offsets = [0, 16], sizes = [8, 8], strides = [1, 1]} : vector<8x32xf32> to vector<8x8xf32>
    %64 = vector.extract_strided_slice %20 {offsets = [0, 16], sizes = [8, 8], strides = [1, 1]} : vector<8x32xf32> to vector<8x8xf32>
    %cst_38 = arith.constant dense<0.000000e+00> : vector<8x8xf32>
    %65 = tpu.matmul %62, %63, %cst_38 {dimension_numbers = #tpu.dot_dimension_numbers<[1], [1], [0], [0], [0, 0, 1, 0], [], []>} : vector<8x8xf32>, vector<8x8xf32>, vector<8x8xf32> -> vector<8x8xf32>
    %cst_39 = arith.constant 0.353553385 : f32
    %66 = vector.broadcast %cst_39 : f32 to vector<8x8xf32>
    %67 = arith.mulf %65, %66 : vector<8x8xf32>
    %cst_40 = arith.constant dense<0xFF800000> : vector<8xf32>
    %68 = vector.multi_reduction <maximumf>, %67, %cst_40 [1] : vector<8x8xf32> to vector<8xf32>
    %69 = vector.shape_cast %68 : vector<8xf32> to vector<8x1xf32>
    %70 = vector.broadcast %69 : vector<8x1xf32> to vector<8x8xf32>
    %71 = arith.subf %67, %70 : vector<8x8xf32>
    %72 = math.exp %71 : vector<8x8xf32>
    %cst_41 = arith.constant dense<0.000000e+00> : vector<8xf32>
    %73 = vector.multi_reduction <add>, %72, %cst_41 [1] : vector<8x8xf32> to vector<8xf32>
    %74 = vector.shape_cast %73 : vector<8xf32> to vector<8x1xf32>
    %75 = tpu.reciprocal %74 : vector<8x1xf32> -> vector<8x1xf32>
    %76 = vector.broadcast %75 : vector<8x1xf32> to vector<8x8xf32>
    %77 = arith.mulf %72, %76 : vector<8x8xf32>
    %cst_42 = arith.constant dense<0.000000e+00> : vector<8x8xf32>
    %78 = tpu.matmul %77, %64, %cst_42 {dimension_numbers = #tpu.dot_dimension_numbers<[1], [0], [0], [1], [0, 0, 1, 1], [], []>} : vector<8x8xf32>, vector<8x8xf32>, vector<8x8xf32> -> vector<8x8xf32>
    %c16 = arith.constant 16 : index
    %c0_43 = arith.constant 0 : index
    %79 = vector.load %arg11[%c16, %c0_43] : memref<32x32xf32, #tpu.memory_space<vmem>>, vector<8x32xf32>
    %cst_44 = arith.constant dense<0.000000e+00> : vector<8x32xf32>
    %80 = tpu.matmul %78, %79, %cst_44 {dimension_numbers = #tpu.dot_dimension_numbers<[1], [0], [0], [1], [0, 0, 1, 1], [], []>} : vector<8x8xf32>, vector<8x32xf32>, vector<8x32xf32> -> vector<8x32xf32>
    %81 = arith.addf %61, %80 : vector<8x32xf32>
    %82 = vector.extract_strided_slice %10 {offsets = [0, 24], sizes = [8, 8], strides = [1, 1]} : vector<8x32xf32> to vector<8x8xf32>
    %83 = vector.extract_strided_slice %15 {offsets = [0, 24], sizes = [8, 8], strides = [1, 1]} : vector<8x32xf32> to vector<8x8xf32>
    %84 = vector.extract_strided_slice %20 {offsets = [0, 24], sizes = [8, 8], strides = [1, 1]} : vector<8x32xf32> to vector<8x8xf32>
    %cst_45 = arith.constant dense<0.000000e+00> : vector<8x8xf32>
    %85 = tpu.matmul %82, %83, %cst_45 {dimension_numbers = #tpu.dot_dimension_numbers<[1], [1], [0], [0], [0, 0, 1, 0], [], []>} : vector<8x8xf32>, vector<8x8xf32>, vector<8x8xf32> -> vector<8x8xf32>
    %cst_46 = arith.constant 0.353553385 : f32
    %86 = vector.broadcast %cst_46 : f32 to vector<8x8xf32>
    %87 = arith.mulf %85, %86 : vector<8x8xf32>
    %cst_47 = arith.constant dense<0xFF800000> : vector<8xf32>
    %88 = vector.multi_reduction <maximumf>, %87, %cst_47 [1] : vector<8x8xf32> to vector<8xf32>
    %89 = vector.shape_cast %88 : vector<8xf32> to vector<8x1xf32>
    %90 = vector.broadcast %89 : vector<8x1xf32> to vector<8x8xf32>
    %91 = arith.subf %87, %90 : vector<8x8xf32>
    %92 = math.exp %91 : vector<8x8xf32>
    %cst_48 = arith.constant dense<0.000000e+00> : vector<8xf32>
    %93 = vector.multi_reduction <add>, %92, %cst_48 [1] : vector<8x8xf32> to vector<8xf32>
    %94 = vector.shape_cast %93 : vector<8xf32> to vector<8x1xf32>
    %95 = tpu.reciprocal %94 : vector<8x1xf32> -> vector<8x1xf32>
    %96 = vector.broadcast %95 : vector<8x1xf32> to vector<8x8xf32>
    %97 = arith.mulf %92, %96 : vector<8x8xf32>
    %cst_49 = arith.constant dense<0.000000e+00> : vector<8x8xf32>
    %98 = tpu.matmul %97, %84, %cst_49 {dimension_numbers = #tpu.dot_dimension_numbers<[1], [0], [0], [1], [0, 0, 1, 1], [], []>} : vector<8x8xf32>, vector<8x8xf32>, vector<8x8xf32> -> vector<8x8xf32>
    %c24 = arith.constant 24 : index
    %c0_50 = arith.constant 0 : index
    %99 = vector.load %arg11[%c24, %c0_50] : memref<32x32xf32, #tpu.memory_space<vmem>>, vector<8x32xf32>
    %cst_51 = arith.constant dense<0.000000e+00> : vector<8x32xf32>
    %100 = tpu.matmul %98, %99, %cst_51 {dimension_numbers = #tpu.dot_dimension_numbers<[1], [0], [0], [1], [0, 0, 1, 1], [], []>} : vector<8x8xf32>, vector<8x32xf32>, vector<8x32xf32> -> vector<8x32xf32>
    %101 = arith.addf %81, %100 : vector<8x32xf32>
    %c0_52 = arith.constant 0 : index
    %c0_53 = arith.constant 0 : index
    %102 = vector.load %arg12[%c0_52, %c0_53] : memref<1x32xf32, #tpu.memory_space<vmem>>, vector<1x32xf32>
    %103 = vector.broadcast %102 : vector<1x32xf32> to vector<8x32xf32>
    %104 = arith.addf %101, %103 : vector<8x32xf32>
    %c0_54 = arith.constant 0 : index
    %c0_55 = arith.constant 0 : index
    %c0_56 = arith.constant 0 : index
    %105 = vector.load %arg13[%c0_54, %c0_55, %c0_56] : memref<1x8x32xf32, #tpu.memory_space<vmem>>, vector<1x8x32xf32>
    %106 = vector.shape_cast %105 : vector<1x8x32xf32> to vector<8x32xf32>
    %107 = vector.shape_cast %104 : vector<8x32xf32> to vector<1x8x32xf32>
    tpu.vector_store %arg13[%c0_54, %c0_55, %c0_56], %107 {strides = array<i32>} : memref<1x8x32xf32, #tpu.memory_space<vmem>>, vector<1x8x32xf32>,
    return
  }
  func.func @transform_0(%arg0: i32, %arg1: i32) -> (i32, i32, i32) {
    %c0_i32 = arith.constant 0 : i32
    %c0_i32_0 = arith.constant 0 : i32
    return %arg0, %arg1, %c0_i32 : i32, i32, i32
  }
  func.func @transform_1(%arg0: i32, %arg1: i32) -> (i32, i32, i32) {
    %c0_i32 = arith.constant 0 : i32
    %c0_i32_0 = arith.constant 0 : i32
    %c0_i32_1 = arith.constant 0 : i32
    return %arg0, %c0_i32, %c0_i32_0 : i32, i32, i32
  }
  func.func @transform_2(%arg0: i32, %arg1: i32) -> (i32, i32, i32) {
    %c0_i32 = arith.constant 0 : i32
    %c0_i32_0 = arith.constant 0 : i32
    %c0_i32_1 = arith.constant 0 : i32
    return %arg0, %c0_i32, %c0_i32_0 : i32, i32, i32
  }
  func.func @transform_3(%arg0: i32, %arg1: i32) -> (i32, i32) {
    %c0_i32 = arith.constant 0 : i32
    %c0_i32_0 = arith.constant 0 : i32
    %c0_i32_1 = arith.constant 0 : i32
    return %c0_i32, %c0_i32_0 : i32, i32
  }
  func.func @transform_4(%arg0: i32, %arg1: i32) -> (i32, i32) {
    %c0_i32 = arith.constant 0 : i32
    %c0_i32_0 = arith.constant 0 : i32
    %c0_i32_1 = arith.constant 0 : i32
    return %c0_i32, %c0_i32_0 : i32, i32
  }
  func.func @transform_5(%arg0: i32, %arg1: i32) -> (i32, i32) {
    %c0_i32 = arith.constant 0 : i32
    %c0_i32_0 = arith.constant 0 : i32
    %c0_i32_1 = arith.constant 0 : i32
    return %c0_i32, %c0_i32_0 : i32, i32
  }
  func.func @transform_6(%arg0: i32, %arg1: i32) -> (i32, i32) {
    %c0_i32 = arith.constant 0 : i32
    %c0_i32_0 = arith.constant 0 : i32
    %c0_i32_1 = arith.constant 0 : i32
    return %c0_i32, %c0_i32_0 : i32, i32
  }
  func.func @transform_7(%arg0: i32, %arg1: i32) -> (i32, i32) {
    %c0_i32 = arith.constant 0 : i32
    %c0_i32_0 = arith.constant 0 : i32
    %c0_i32_1 = arith.constant 0 : i32
    return %c0_i32, %c0_i32_0 : i32, i32
  }
  func.func @transform_8(%arg0: i32, %arg1: i32) -> (i32, i32) {
    %c0_i32 = arith.constant 0 : i32
    %c0_i32_0 = arith.constant 0 : i32
    %c0_i32_1 = arith.constant 0 : i32
    return %c0_i32, %c0_i32_0 : i32, i32
  }
  func.func @transform_9(%arg0: i32, %arg1: i32) -> (i32, i32) {
    %c0_i32 = arith.constant 0 : i32
    %c0_i32_0 = arith.constant 0 : i32
    %c0_i32_1 = arith.constant 0 : i32
    return %c0_i32, %c0_i32_0 : i32, i32
  }
  func.func @transform_10(%arg0: i32, %arg1: i32) -> (i32, i32) {
    %c0_i32 = arith.constant 0 : i32
    %c0_i32_0 = arith.constant 0 : i32
    %c0_i32_1 = arith.constant 0 : i32
    return %c0_i32, %c0_i32_0 : i32, i32
  }
  func.func @transform_11(%arg0: i32, %arg1: i32) -> (i32, i32, i32) {
    %c0_i32 = arith.constant 0 : i32
    %c0_i32_0 = arith.constant 0 : i32
    return %arg0, %arg1, %c0_i32 : i32, i32, i32
  }
}

</mosaic_0001>

<bundles_post_ra>
// kernel: tpu_custom_call.1
= control target key start
LH: loop header
LB: loop body
LE: loop exit
PB: predicated region body
PF: predicated region fallthrough
CT: control target
= control target key end

     0   :  { %s2103_s0 = inlined_call_operand.hbm [shape: f32[2,8,32], index: 0, kind: input, shape index: {}]   ;;  %s2104_s1 = inlined_call_operand.hbm [shape: f32[2,8,32], index: 1, kind: input, shape index: {}]   ;;  %s2105_s2 = inlined_call_operand.hbm [shape: f32[2,8,32], index: 2, kind: input, shape index: {}]   ;;  %s2106_s3 = inlined_call_operand.hbm [shape: f32[32,32], index: 3, kind: input, shape index: {}]   ;;  %s2107_s4 = inlined_call_operand.vmem [shape: f32[1,32], index: 4, kind: input, shape index: {}]   ;;  %s2108_s5 = inlined_call_operand.hbm [shape: f32[32,32], index: 5, kind: input, shape index: {}]   ;;  %s2109_s6 = inlined_call_operand.vmem [shape: f32[1,32], index: 6, kind: input, shape index: {}]   ;;  %s2110_s7 = inlined_call_operand.hbm [shape: f32[32,32], index: 7, kind: input, shape index: {}]   ;;  %s2111_s8 = inlined_call_operand.vmem [shape: f32[1,32], index: 8, kind: input, shape index: {}]   ;;  %s2112_s9 = inlined_call_operand.hbm [shape: f32[32,32], index: 9, kind: input, shape index: {}]   ;;  %s2113_s10 = inlined_call_operand.vmem [shape: f32[1,32], index: 10, kind: input, shape index: {}]   ;;  %s2114_s11 = inlined_call_operand.hbm [shape: f32[2,8,32], index: 11, kind: output, shape index: {}]  }
   0x1   :  { %2128 = sst [smem:[#allocation27_spill]] %s2103_s0 }
   0x2   :  { %2129 = sst [smem:[#allocation28_spill]] %s2104_s1 }
   0x3   :  { %2130 = sst [smem:[#allocation29_spill]] %s2106_s3 }
   0x4   :  { %2131 = sst [smem:[#allocation30_spill]] %s2108_s5 }
   0x5   :  { %2132 = sst [smem:[#allocation31_spill]] %s2110_s7 }
   0x6   :  { %2133 = sst [smem:[#allocation32_spill]] %s2112_s9 }
   0x7   :  { %2134 = sst [smem:[#allocation33_spill]] %s2113_s10 }
   0x8   :  { %16 = vsyncpa [#allocation3], 0 }
   0x9   :  { %18 = vsyncpa [#allocation3 + $0x1], 0 }
   0xa   :  { %19 = vsyncpa [#allocation6], 0 }
   0xb   :  { %21 = vsyncpa [#allocation6 + $0x1], 0 }
   0xc   :  { %22 = vsyncpa [#allocation9], 0 }
   0xd   :  { %23 = vsyncpa [#allocation12], 0 }
   0xe   :  { %24 = vsyncpa [#allocation4], 0 }
   0xf   :  { %26 = vsyncpa [#allocation4 + $0x1], 0  ;;  %s1813_s17 = smov 0   ;;  %s1815_s18 = smov 0  }
  0x10   :  { %s1817_s19 = smov 0   ;;  %s1819_s20 = smov 0  }
  0x11   :  { %s1821_s21 = smov 0   ;;  %s1823_s22 = smov 0  }
  0x12 LB: > { %2135 = sst [smem:[#allocation20_spill]] %s1722_s17  ;;  %s1844_s23 = sadd.s32 4294967295, %s1742_s22   ;;  %s1742_s22 = sphi %s1823_s22, %s32_s22   ;;  %s1738_s21 = sphi %s1821_s21, %s2165_s21   ;;  %s1734_s20 = sphi %s1819_s20, %s2164_s20   ;;  %s1730_s19 = sphi %s1817_s19, %s2168_s19   ;;  %s1726_s18 = sphi %s1815_s18, %s2167_s18   ;;  %s1722_s17 = sphi %s1813_s17, %s2166_s17  }
  0x13   : > { %2136 = sst [smem:[#allocation21_spill]] %s1738_s21  ;;  %p1256_p0 = scmp.ge.s32.totalorder %s1742_s22, 1 }
  0x14   : > { %2137 = sst [smem:[#allocation22_spill]] %s1742_s22  ;;  %p67_p1 = scmp.eq.s32.totalorder %s1844_s23, 0 }
  0x15   : > { %p325_p2 = scmp.lt.s32.totalorder %s1742_s22, 3  ;;  %s2138_s3 = sld [smem:[#allocation29_spill]] }
  0x16   : > { %s1744_s28 = smov [#allocation8]   ;;  %p1261_p6 = scmp.ge.s32.totalorder %s1742_s22, 2 }
  0x17   : > { %p1852_p3 = pnand %p1256_p0, %p325_p2  ;;  %s338_s29 = sshll.u32 %s1744_s28, 4  ;;  %s339_s29 = int_to_ptr.vmem [resolvable:$true] %s338_s29 }
  0x18   : > { %s2141_s7 = sld [smem:[#allocation31_spill]]  ;;  %s2115_s15 = smov 128  }
  0x19   : > { %p1324_p4 = pneg %p1852_p3  ;;  %s2117_s16 = smov 8  }
  0x1a   : > { %s1747_s24 = smov [#allocation11]   ;;  %s1255_s28 = sadd.s32 4294967294, %s1742_s22  }
  0x1b   : > { %s336_s26 = sshll.u32 %s2138_s3, 4  ;;  %p1860_p5 = pnand %p1324_p4, %p67_p1  ;;  %s337_s26 = int_to_ptr.hbm [resolvable:$true] %s336_s26 }
  0x1c   : > { %s372_s25 = sshll.u32 %s1747_s24, 4  ;;  %s44_s12 = sadd.s32 1, %s1738_s21  ;;  %s373_s25 = int_to_ptr.vmem [resolvable:$true] %s372_s25 }
  0x1d   : > { %1327 = dma.hbm_to_vmem [thread:$0]  (!%p1860_p5), %s337_s26, 512, %s339_s29, [#allocation9], %s2115_s15, %s2115_s15, %s2117_s16  }
  0x1e   : > { %s370_s14 = sshll.u32 %s2141_s7, 4  ;;  %p46_p7 = scmp.ge.s32.totalorder %s44_s12, 2  ;;  %s371_s14 = int_to_ptr.hbm [resolvable:$true] %s370_s14 }
  0x1f   : > { %1333 = dma.hbm_to_vmem [thread:$0]  (!%p1860_p5), %s371_s14, 512, %s373_s25, [#allocation12], %s2115_s15, %s2115_s15, %s2117_s16  }
  0x20   : > { %s53_s13 = sadd.s32 1, %s1730_s19  ;;  %p60_p8 = scmp.ne.s32.totalorder %s1730_s19, %s1726_s18 }
  0x21   : > { %p61_p9 = scmp.eq.s32.totalorder %s1742_s22, 0  ;;  %s2170_s12 = smov (%p46_p7, %s44_s12), 0 }
  0x22   : > { %2142 = sst [smem:[#allocation23_spill]] %s2170_s12  ;;  %p66_p11 = scmp.ne.s32.totalorder %s1726_s18, %s1722_s17 }
  0x23   : > { %p1886_p10 = por %p61_p9, %p60_p8  ;;  %s48_s29 = ssub.s32 %s1738_s21, %s2170_s12 }
  0x24   : > { %p312_p12 = scmp.eq.s32.totalorder %s1844_s23, 1  ;;  %p51_p13 = scmp.eq.s32.totalorder %s48_s29, 0 }
  0x25   : > { %p1897_p0 = por %p67_p1, %p66_p11  ;;  %p318_p4 = scmp.eq.s32.totalorder %s1255_s28, 1 }
  0x26   : > { %p1901_p2 = por %p312_p12, %p60_p8  ;;  %p1355_p9 = scmp.lt.s32.totalorder %s1742_s22, 2 }
  0x27   : > { %s1906_s25 = scalar_select %p51_p13, %s1730_s19, %s53_s13  }
  0x28   : > { %s2145_s24 = scalar_select %p1901_p2, 1, 0 }
  0x29   : > { %2147 = sst [smem:[#allocation25_spill]] %s1906_s25  ;;  %p1908_p7 = por %p318_p4, %p66_p11 }
  0x2a   : > { %2146 = sst [smem:[#allocation24_spill]] %s2145_s24  ;;  %s2123_s16 = sand.u32 1, %s1730_s19  }
  0x2b   : > { %s2148_s15 = scalar_select %p1908_p7, 1, 0 }
  0x2c   : > { %s1915_s3 = sshll.u32 %s1738_s21, 3  ;;  %s1919_s29 = sshll.u32 %s2123_s16, 3 }
  0x2d   : > { %2149 = sst [smem:[#allocation26_spill]] %s2148_s15  ;;  %p1923_p8 = pnand %p1355_p9, %p1886_p10 }
  0x2e   : > { %s426_s28 = sand.u32 1, %s1742_s22   ;;  %s2151_s1 = sld [smem:[#allocation28_spill]] }
  0x2f   : > { %s430_s15 = scalar_lea.vmem [#allocation5], %s1919_s29  ;;  %s2152_s5 = sld [smem:[#allocation30_spill]] }
  0x30   : > { %s438_s21 = sshll.u32 %s430_s15, 4  ;;  %s427_s10 = scalar_lea.sflag [#allocation6], %s426_s28  ;;  %s439_s21 = int_to_ptr.vmem [resolvable:$true] %s438_s21 }
  0x31   : > { %s1748_s22 = smov [#allocation10]   ;;  %s2153_s9 = sld [smem:[#allocation32_spill]] }
  0x32   : > { %s355_s12 = sshll.u32 %s1748_s22, 4  ;;  %s2155_s16 = smov 128   ;;  %s356_s12 = int_to_ptr.vmem [resolvable:$true] %s355_s12 }
  0x33   : > { %s1749_s28 = smov [#allocation13]   ;;  %s2156_s0 = sld [smem:[#allocation27_spill]] }
  0x34   : > { %s434_s25 = scalar_lea.hbm %s2151_s1, %s1915_s3  ;;  %s410_s13 = scalar_lea.vmem [#allocation2], %s1919_s29 }
  0x35   : > { %s436_s17 = sshll.u32 %s434_s25, 4  ;;  %s353_s24 = sshll.u32 %s2152_s5, 4  ;;  %s437_s17 = int_to_ptr.hbm [resolvable:$true] %s436_s17  ;;  %s354_s24 = int_to_ptr.hbm [resolvable:$true] %s353_s24 }
  0x36   : > { %1343 = dma.hbm_to_vmem [thread:$0]  (!%p1923_p8), %s437_s17, 128, %s439_s21, %s427_s10  }
  0x37   : > { %s387_s15 = sshll.u32 %s2153_s9, 4  ;;  %s2154_s25 = smov 8   ;;  %s388_s15 = int_to_ptr.hbm [resolvable:$true] %s387_s15 }
  0x38   : > { %1330 = dma.hbm_to_vmem [thread:$0]  (!%p1860_p5), %s354_s24, 512, %s356_s12, [#allocation9], %s2155_s16, %s2155_s16, %s2154_s25  }
  0x39   : > { %s389_s17 = sshll.u32 %s1749_s28, 4  ;;  %s415_s22 = scalar_lea.hbm %s2156_s0, %s1915_s3  ;;  %s390_s17 = int_to_ptr.vmem [resolvable:$true] %s389_s17 }
  0x3a   : > { %1336 = dma.hbm_to_vmem [thread:$0]  (!%p1860_p5), %s388_s15, 512, %s390_s17, [#allocation12], %s2155_s16, %s2155_s16, %s2154_s25  }
  0x3b   : > { %s417_s1 = sshll.u32 %s415_s22, 4  ;;  %s419_s5 = sshll.u32 %s410_s13, 4  ;;  %s418_s1 = int_to_ptr.hbm [resolvable:$true] %s417_s1  ;;  %s420_s5 = int_to_ptr.vmem [resolvable:$true] %s419_s5 }
  0x3c   : > { %s2157_s9 = sand.u32 1, %s1730_s19   ;;  %s453_s21 = scalar_lea.hbm %s2105_s2, %s1915_s3 }
  0x3d   : > { %s407_s24 = scalar_lea.sflag [#allocation3], %s2157_s9  ;;  %s455_s26 = sshll.u32 %s453_s21, 4  ;;  %s456_s26 = int_to_ptr.hbm [resolvable:$true] %s455_s26 }
  0x3e   : > { %1340 = dma.hbm_to_vmem [thread:$0]  (!%p1923_p8), %s418_s1, 128, %s420_s5, %s407_s24  }
  0x3f   : > { %s449_s0 = scalar_lea.vmem [#allocation7], %s1919_s29  ;;  %466 = sbr.rel (%p1852_p3) target bundleno = 1425 (0x591), region = 64 }
  0x40   : > { %s457_s30 = sshll.u32 %s449_s0, 4  ;;  %s1970_s15 = sand.u32 (!%p1852_p3), 1, %s1726_s18   ;;  %s458_s30 = int_to_ptr.vmem [resolvable:$true] %s457_s30 }
  0x41   : > { %1346 = dma.hbm_to_vmem [thread:$0]  (!%p1923_p8), %s456_s26, 128, %s458_s30, %s427_s10  }
  0x42   : > { %s1973_s5 = sshll.u32 (!%p1852_p3), %s1970_s15, 3  ;;  %s469_s3 = scalar_lea.sflag (!%p1852_p3), [#allocation3], %s1970_s15 }
  0x43   : > { %s472_s9 = scalar_lea.vmem (!%p1852_p3), [#allocation2], %s1973_s5 }
  0x44   : > { %1701 = dma.done.wait (%p1897_p0), %s469_s3, 128  }
  0x45   : > { %1703 = vsyncadd (%p1897_p0), %s469_s3, 4294967168  ;;  %s478_s0 = sand.u32 1, %s1844_s23   ;;  %s482_s10 = scalar_lea.vmem [#allocation5], %s1973_s5 }
  0x46   : > { %s479_s7 = scalar_lea.sflag [#allocation6], %s478_s0 }
  0x47   : > { %1705 = dma.done.wait (%p1897_p0), %s479_s7, 256  }
  0x48   : > { %1707 = vsyncadd (%p1897_p0), %s479_s7, 4294967040  ;;  %s492_s27 = scalar_lea.vmem [#allocation7], %s1973_s5 }
  0x49   : > { %1709 = dma.done.wait (%p67_p1), [#allocation9], 1024  }
  0x4a   : > { %1711 = vsyncadd (%p67_p1), [#allocation9], 4294966272 }
  0x4b   : > { %1713 = dma.done.wait (%p67_p1), [#allocation12], 1024  }
  0x4c   : > { %1715 = vsyncadd (%p67_p1), [#allocation12], 4294966272  ;;  %v600_v0 = vld [vmem:[#allocation10 + $0x18] sm:$0xff]  ;;  %v599_v1 = vld [vmem:[#allocation10 + $0x10] sm:$0xff]  ;;  %vm573_vm0 = vcmask 261120   ;;  %vm659_vm1 = vcmask 64512  }
  0x4d   : > { %v568_v2 = vld [vmem:[#allocation8 + $0x18] sm:$0xff]  ;;  %620 = vmatpush.msra.mxu1 %v600_v0  ;;  %v567_v3 = vld [vmem:[#allocation8 + $0x10] sm:$0xff]  ;;  %v598_v4 = vld [vmem:[#allocation10 + $0x8] sm:$0xff]  ;;  %s1750_s16 = smov 112   ;;  %s1751_s17 = smov 120  }
  0x4e   : > { %589 = vmatpush.msra.mxu0 %v568_v2  ;;  %v566_v5 = vld [vmem:[#allocation8 + $0x8] sm:$0xff]  ;;  %v597_v6 = vld [vmem:[#allocation10] sm:$0xff]  ;;  %v562_v9 = vld [vmem:[%s472_s9] sm:$0xff]  ;;  %s1752_s22 = smov 104   ;;  %s1297_s24 = sshll.u32 %s1734_s20, 3 }
  0x4f   : > { %621 = vmatpush.msra.mxu1 %v599_v1  ;;  %v565_v7 = vld [vmem:[#allocation8] sm:$0xff]  ;;  %v1418_v10 = vld [vmem:[%s2109_s6] ss:$0 sm:$0xff]  ;;  %v631_v22 = vld [vmem:[#allocation11 + $0x18] sm:$0xff]  ;;  %s1088_s21 = scalar_lea.hbm %s2114_s11, %s1297_s24  ;;  %s2158_s3 = sld [smem:[#allocation33_spill]] }
  0x50   : > { %590 = vmatpush.msra.mxu0 %v567_v3  ;;  %v563_v8 = vld [vmem:[%s482_s10] sm:$0xff]  ;;  %v1419_v11 = vld [vmem:[%s2107_s4] ss:$0 sm:$0xff]  ;;  %651 = vmatpush.msra.mxu2 %v631_v22  ;;  %s561_s0 = scalar_lea.vmem [#allocation14], %s1973_s5  ;;  %s1092_s10 = sshll.u32 %s1088_s21, 4  ;;  %s1093_s10 = int_to_ptr.hbm [resolvable:$true] %s1092_s10 }
  0x51   : > { %622 = vmatpush.msra.mxu1 %v598_v4  ;;  %v630_v23 = vld [vmem:[#allocation11 + $0x10] sm:$0xff]  ;;  %v629_v24 = vld [vmem:[#allocation11 + $0x8] sm:$0xff]  ;;  %v628_v25 = vld [vmem:[#allocation11] sm:$0xff]  ;;  %s1090_s7 = sshll.u32 %s561_s0, 4  ;;  %s1077_s20 = scalar_lea.sflag [#allocation4], %s1970_s15  ;;  %s1091_s7 = int_to_ptr.vmem [resolvable:$true] %s1090_s7 }
  0x52   : > { %591 = vmatpush.msra.mxu0 %v566_v5  ;;  %652 = vmatpush.msra.mxu2 %v630_v23  ;;  %v564_v26 = vld [vmem:[%s492_s27] sm:$0xff]  ;;  %v734_v39 = vld [vmem:[#allocation13] sm:$0xff]  ;;  %s1662_s27 = sshra.s32 %s1093_s10, 4  ;;  %s1668_s5 = scalar_lea.hbm %s2114_s11, 16  ;;  %s1663_s27 = int_to_ptr.hbm [resolvable:$true] %s1662_s27 }
  0x53   : > { %623 = vmatpush.msra.mxu1 %v597_v6  ;;  %v1420_v36 = vld [vmem:[%s2111_s8] ss:$0 sm:$0xff]  ;;  %s1664_s23 = scalar_lea.hbm %s1663_s27, 8  ;;  %p1669_p10 = scmp.lt.s32.totalorder %s1663_s27, %s2114_s11 }
  0x54   : > { %592 = vmatpush.msra.mxu0 %v565_v7  ;;  %1278 = vmatmul.msk.f32.vlgmr.msra.gmra.mxu1 %vm573_vm0, %v563_v8  ;;  %p1665_p1 = scmp.ne.s32.totalorder %s1663_s27, %s1664_s23  ;;  %p1670_p11 = scmp.lt.s32.totalorder %s1668_s5, %s1664_s23 }
  0x55   : > { %1277 = vmatmul.msk.f32.vlgmr.msra.gmra.mxu0 %vm573_vm0, %v562_v9  ;;  %653 = vmatpush.msra.mxu2 %v629_v24 }
  0x56   : > { %p1666_p3 = pnand %p1665_p1, %p1901_p2  ;;  %p1671_p12 = por %p1670_p11, %p1669_p10 }
  0x57   : > { %654 = vmatpush.msra.mxu2 %v628_v25 }
  0x58   : > { %1279 = vmatmul.msk.f32.vlgmr.msra.gmra.mxu2 %vm573_vm0, %v564_v26  ;;  %p1667_p5 = pneg %p1666_p3 }
  0x5a   : > { %p1672_p13 = pnand %p1671_p12, %p1667_p5 }
  0xd1   : > { %v625_v12 = vpop.f32.mrf.mxu1 }
  0xd2   : > { %v594_v13 = vpop.f32.mrf.mxu0  ;;  %v626_v14 = vadd.f32 %v1418_v10, %v625_v12 }
  0xd3   : > { %v595_v15 = vadd.f32 %v1419_v11, %v594_v13 }
  0xd4   : > { %864 = vrot.lane.b32.xlu2 %v626_v14, %s1750_s16  ;;  %737 = vrot.lane.b32.xlu1 %v626_v14, %s1751_s17 }
  0xd5   : > { %1280 = vmatpush.xpose.msk.msra.mxu3 %vm659_vm1, %v626_v14 }
  0xd8   : > { %1281 = vmatmul.msk.f32.vlgmr.msra.gmra.mxu3 %vm659_vm1, %v595_v15 }
  0xdb   : > { %v656_v37 = vpop.f32.mrf.mxu2 }
  0xdc   : > { %968 = vrot.lane.b32.xlu2 %v626_v14, %s1752_s22  ;;  %735 = vrot.lane.b32.xlu1 %v595_v15, %s1751_s17  ;;  %v2024_v38 = vadd.f32 %v1420_v36, %v656_v37 }
  0xde   : > { %729 = vmatpush.msrb.mxu3 %v2024_v38 }
  0xe0   : > { %857 = vmatpush.msra.mxu3 %v734_v39 }
  0xe4   : > { %966 = vrot.lane.b32.xlu1 %v595_v15, %s1752_s22 }
 0x12e   : > { %v865_v17 = vpop.permute.xlu2 %864 }
 0x136   : > { %v969_v35 = vpop.permute.xlu2 %968 }
 0x146   : > { %v738_v16 = vpop.permute.xlu1 %737 }
 0x147   : > { %1283 = vmatpush.xpose.msk.msrb.mxu0 %vm659_vm1, %v738_v16 }
 0x14b   : > { %1288 = vmatpush.xpose.msk.msra.mxu0 %vm659_vm1, %v865_v17 }
 0x14e   : > { %v736_v18 = vpop.permute.xlu1 %735 }
 0x14f   : > { %1284 = vmatmul.msk.f32.vlgmr.msrb.gmra.mxu0 %vm659_vm1, %v736_v18 }
 0x156   : > { %v967_v62 = vpop.permute.xlu1 %966 }
 0x15b   : > { %v683_v19 = vpop.f32.mrf.mxu3 }
 0x15c   : > { %v686_v20 = vmul.f32 0.35355338, %v683_v19 }
 0x15e   : > { %v687_v21 = vsel %vm659_vm1, %v686_v20, -inf }
 0x15f   : > { %688 = vmax.xlane.f32.xlu0 %v687_v21 }
 0x1cc   : > { %v760_v27 = vpop.f32.mrf.mxu0 }
 0x1cd   : > { %v763_v28 = vmul.f32 0.35355338, %v760_v27 }
 0x1cf   : > { %v764_v29 = vsel %vm659_vm1, %v763_v28, -inf }
 0x1d0   : > { %765 = vmax.xlane.f32.xlu2 %v764_v29 }
 0x1d2   : > { %v689_v30 = vpop.xlane.xlu0 %688 }
 0x1d3   : > { %v690_v31 = vsub.f32 %v686_v20, %v689_v30 }
 0x1d5   : > { %v691_v32 = vmul.f32 1.442695, %v690_v31 }
 0x1d7   : > { %1422 = vpow2.f32 %v691_v32 }
 0x1dd   : > { %v1423_v33 = vpop.eup %1422 }
 0x1de   : > { %v693_v34 = vsel %vm659_vm1, %v1423_v33, 0.0 }
 0x1df   : > { %694 = vadd.xlane.f32.xlu0 %v693_v34 }
 0x1f3   : > { %862 = vrot.lane.b32.xlu0 %v595_v15, %s1750_s16 }
 0x243   : > { %v766_v40 = vpop.xlane.xlu2 %765 }
 0x244   : > { %v767_v41 = vsub.f32 %v763_v28, %v766_v40  ;;  %v815_v28 = vld [vmem:[#allocation13 + $0x8] sm:$0xff] }
 0x245   : > { %834 = vmatpush.msrb.mxu2 %v815_v28 }
 0x246   : > { %v768_v42 = vmul.f32 1.442695, %v767_v41 }
 0x248   : > { %1424 = vpow2.f32 %v768_v42 }
 0x24e   : > { %v2027_v43 = vpop.eup %1424 }
 0x24f   : > { %v770_v44 = vsel %vm659_vm1, %v2027_v43, 0.0 }
 0x250   : > { %771 = vadd.xlane.f32.xlu2 %v770_v44 }
 0x252   : > { %v695_v45 = vpop.xlane.xlu0 %694 }
 0x253   : > { %1426 = vrcp.f32 %v695_v45  ;;  %v707_v49 = vand.u32 2147483648, %v695_v45  ;;  %v705_v51 = vand.u32 2147483647, %v695_v45  ;;  %vm701_vm3 = vweird.f32 %v695_v45 }
 0x255   : > { %v708_v53 = vor.u32 1.1754944e-38, %v707_v49  ;;  %vm706_vm5 = vcmp.eq.f32.partialorder %v705_v51, 8.507059e+37 }
 0x259   : > { %v1427_v46 = vpop.eup %1426 }
 0x25a   : > { %v697_v47 = vmul.f32 %v1427_v46, %v695_v45  ;;  %vm702_vm2 = vweird.f32 %v1427_v46 }
 0x25b   : > { %vm703_vm4 = vmor %vm701_vm3, %vm702_vm2 }
 0x25c   : > { %v698_v48 = vsub.f32 1.0, %v697_v47 }
 0x25e   : > { %v699_v50 = vmul.f32 %v1427_v46, %v698_v48 }
 0x260   : > { %v700_v52 = vadd.f32 %v1427_v46, %v699_v50 }
 0x262   : > { %v704_v54 = vsel %vm703_vm4, %v1427_v46, %v700_v52 }
 0x263   : > { %v709_v55 = vsel %vm706_vm5, %v708_v53, %v704_v54  ;;  %v1045_v54 = vld [vmem:[#allocation13 + $0x18] sm:$0xff] }
 0x264   : > { %v710_v56 = vmul.f32 %v1423_v33, %v709_v55  ;;  %v941_v55 = vld [vmem:[#allocation13 + $0x10] sm:$0xff] }
 0x265   : > { %v863_v57 = vpop.permute.xlu0 %862  ;;  %960 = vmatpush.msra.mxu2 %v941_v55 }
 0x266   : > { %1282 = vmatmul.msk.f32.vlgmr.msrb.gmra.mxu3 %vm659_vm1, %v710_v56  ;;  %1289 = vmatmul.msk.f32.vlgmr.msra.gmra.mxu0 %vm659_vm1, %v863_v57 }
 0x267   : > { %1292 = vmatpush.xpose.msk.msrb.mxu3 %vm659_vm1, %v969_v35 }
 0x2c3   : > { %v772_v8 = vpop.xlane.xlu2 %771 }
 0x2c4   : > { %v784_v14 = vand.u32 2147483648, %v772_v8  ;;  %vm778_vm7 = vweird.f32 %v772_v8  ;;  %v782_v15 = vand.u32 2147483647, %v772_v8 }
 0x2c6   : > { %v785_v18 = vor.u32 1.1754944e-38, %v784_v14  ;;  %vm783_vm9 = vcmp.eq.f32.partialorder %v782_v15, 8.507059e+37 }
 0x2e3   : > { %v887_v58 = vpop.f32.mrf.mxu0 }
 0x2e4   : > { %v890_v59 = vmul.f32 0.35355338, %v887_v58 }
 0x2e6   : > { %v891_v60 = vsel %vm659_vm1, %v890_v59, -inf }
 0x2e7   : > { %892 = vmax.xlane.f32.xlu1 %v891_v60 }
 0x2e9   : > { %v731_v61 = vpop.f32.mrf.mxu3 }
 0x2ea   : > { %1287 = vmatmul.msk.f32.vlgmr.msra.gmra.mxu3 %vm659_vm1, %v731_v61 }
 0x2f2   : > { %1293 = vmatmul.msk.f32.vlgmr.msrb.gmra.mxu3 %vm659_vm1, %v967_v62  ;;  %v1421_v62 = vld [vmem:[%s2158_s3] ss:$0 sm:$0xff] }
 0x35a   : > { %v893_v63 = vpop.xlane.xlu1 %892 }
 0x35b   : > { %v894_v0 = vsub.f32 %v890_v59, %v893_v63 }
 0x35d   : > { %v895_v1 = vmul.f32 1.442695, %v894_v0 }
 0x35f   : > { %1428 = vpow2.f32 %v895_v1 }
 0x360   : > { %1430 = vrcp.f32 %v772_v8 }
 0x365   : > { %v2037_v2 = vpop.eup %1428 }
 0x366   : > { %v897_v3 = vsel %vm659_vm1, %v2037_v2, 0.0  ;;  %v1431_v9 = vpop.eup %1430 }
 0x367   : > { %898 = vadd.xlane.f32.xlu2 %v897_v3  ;;  %v774_v10 = vmul.f32 %v1431_v9, %v772_v8  ;;  %vm779_vm6 = vweird.f32 %v1431_v9 }
 0x368   : > { %vm780_vm8 = vmor %vm778_vm7, %vm779_vm6 }
 0x369   : > { %v775_v11 = vsub.f32 1.0, %v774_v10 }
 0x36b   : > { %v776_v12 = vmul.f32 %v1431_v9, %v775_v11 }
 0x36d   : > { %v2041_v4 = vpop.f32.mrf.mxu3  ;;  %v777_v13 = vadd.f32 %v1431_v9, %v776_v12 }
 0x36f   : > { %v781_v17 = vsel %vm780_vm8, %v1431_v9, %v777_v13 }
 0x370   : > { %v786_v19 = vsel %vm783_vm9, %v785_v18, %v781_v17 }
 0x371   : > { %v787_v21 = vmul.f32 %v2027_v43, %v786_v19 }
 0x375   : > { %v991_v5 = vpop.f32.mrf.mxu3 }
 0x376   : > { %v994_v6 = vmul.f32 0.35355338, %v991_v5 }
 0x378   : > { %v995_v7 = vsel %vm659_vm1, %v994_v6, -inf }
 0x379   : > { %996 = vmax.xlane.f32.xlu0 %v995_v7 }
 0x37f   : > { %789 = vrot.lane.b32.xlu2 %v2024_v38, %s1751_s17 }
 0x38d   : > { %1019 = vrot.lane.b32.xlu0 %v2024_v38, %s1752_s22 }
 0x3da   : > { %v899_v16 = vpop.xlane.xlu2 %898 }
 0x3db   : > { %v911_v43 = vand.u32 2147483648, %v899_v16  ;;  %vm905_vm14 = vweird.f32 %v899_v16  ;;  %v909_v45 = vand.u32 2147483647, %v899_v16 }
 0x3dd   : > { %v912_v50 = vor.u32 1.1754944e-38, %v911_v43  ;;  %vm910_vm3 = vcmp.eq.f32.partialorder %v909_v45, 8.507059e+37 }
 0x3e2   : > { %v790_v20 = vpop.permute.xlu2 %789 }
 0x3e3   : > { %810 = vmatpush.msrb.mxu1 %v790_v20 }
 0x3e4   : > { %1285 = vmatmul.msk.f32.vlgmr.msrb.gmra.mxu1 %vm659_vm1, %v787_v21 }
 0x3ec   : > { %v997_v22 = vpop.xlane.xlu0 %996 }
 0x3ed   : > { %v998_v23 = vsub.f32 %v994_v6, %v997_v22 }
 0x3ef   : > { %v999_v24 = vmul.f32 1.442695, %v998_v23 }
 0x3f1   : > { %1432 = vpow2.f32 %v999_v24 }
 0x3f2   : > { %1434 = vrcp.f32 %v899_v16 }
 0x3f7   : > { %v1433_v25 = vpop.eup %1432 }
 0x3f8   : > { %v1001_v26 = vsel %vm659_vm1, %v1433_v25, 0.0  ;;  %v1435_v30 = vpop.eup %1434 }
 0x3f9   : > { %1002 = vadd.xlane.f32.xlu1 %v1001_v26  ;;  %v901_v32 = vmul.f32 %v1435_v30, %v899_v16  ;;  %vm906_vm11 = vweird.f32 %v1435_v30 }
 0x3fa   : > { %vm907_vm2 = vmor %vm905_vm14, %vm906_vm11 }
 0x3fb   : > { %v902_v33 = vsub.f32 1.0, %v901_v32 }
 0x3fd   : > { %v903_v36 = vmul.f32 %v1435_v30, %v902_v33 }
 0x3ff   : > { %v1020_v27 = vpop.permute.xlu0 %1019 }
 0x400   : > { %1040 = vmatpush.msrb.mxu0 %v1020_v27 }
 0x412   : > { %915 = vrot.lane.b32.xlu1 %v2024_v38, %s1750_s16  ;;  %v904_v38 = vadd.f32 %v1435_v30, %v903_v36 }
 0x414   : > { %v908_v48 = vsel %vm907_vm2, %v1435_v30, %v904_v38 }
 0x415   : > { %v913_v51 = vsel %vm910_vm3, %v912_v50, %v908_v48 }
 0x416   : > { %v914_v53 = vmul.f32 %v2037_v2, %v913_v51 }
 0x461   : > { %v812_v29 = vpop.f32.mrf.mxu1 }
 0x462   : > { %1286 = vmatmul.msk.f32.vlgmr.msrb.gmra.mxu2 %vm659_vm1, %v812_v29 }
 0x46c   : > { %v1003_v31 = vpop.xlane.xlu1 %1002 }
 0x46d   : > { %1436 = vrcp.f32 %v1003_v31  ;;  %v1015_v39 = vand.u32 2147483648, %v1003_v31  ;;  %v1013_v41 = vand.u32 2147483647, %v1003_v31  ;;  %vm1009_vm12 = vweird.f32 %v1003_v31 }
 0x46f   : > { %v1016_v44 = vor.u32 1.1754944e-38, %v1015_v39  ;;  %vm1014_vm15 = vcmp.eq.f32.partialorder %v1013_v41, 8.507059e+37 }
 0x473   : > { %v1437_v34 = vpop.eup %1436 }
 0x474   : > { %v1005_v35 = vmul.f32 %v1437_v34, %v1003_v31  ;;  %vm1010_vm10 = vweird.f32 %v1437_v34 }
 0x475   : > { %vm1011_vm13 = vmor %vm1009_vm12, %vm1010_vm10 }
 0x476   : > { %v1006_v37 = vsub.f32 1.0, %v1005_v35 }
 0x478   : > { %v1007_v40 = vmul.f32 %v1437_v34, %v1006_v37 }
 0x47a   : > { %v1008_v42 = vadd.f32 %v1437_v34, %v1007_v40 }
 0x47c   : > { %v1012_v46 = vsel %vm1011_vm13, %v1437_v34, %v1008_v42 }
 0x47d   : > { %v1017_v47 = vsel %vm1014_vm15, %v1016_v44, %v1012_v46 }
 0x47e   : > { %v1018_v49 = vmul.f32 %v1433_v25, %v1017_v47 }
 0x480   : > { %1294 = vmatmul.msk.f32.vlgmr.msrb.gmra.mxu0 %vm659_vm1, %v1018_v49 }
 0x484   : > { %v916_v52 = vpop.permute.xlu1 %915 }
 0x485   : > { %936 = vmatpush.msra.mxu1 %v916_v52 }
 0x486   : > { %1290 = vmatmul.msk.f32.vlgmr.msra.gmra.mxu1 %vm659_vm1, %v914_v53 }
 0x487   : > { %1064 = vmatpush.msrb.mxu1 %v1045_v54 }
 0x4e5   : > { %v836_v58 = vpop.f32.mrf.mxu2 }
 0x4e6   : > { %v860_v59 = vadd.f32 %v2041_v4, %v836_v58 }
 0x4fd   : > { %v1042_v56 = vpop.f32.mrf.mxu0 }
 0x4fe   : > { %1295 = vmatmul.msk.f32.vlgmr.msrb.gmra.mxu1 %vm659_vm1, %v1042_v56 }
 0x503   : > { %v938_v57 = vpop.f32.mrf.mxu1 }
 0x504   : > { %1291 = vmatmul.msk.f32.vlgmr.msra.gmra.mxu2 %vm659_vm1, %v938_v57 }
 0x57b   : > { %v1066_v63 = vpop.f32.mrf.mxu1 }
 0x587   : > { %v962_v60 = vpop.f32.mrf.mxu2 }
 0x588   : > { %v965_v61 = vadd.f32 %v962_v60, %v860_v59 }
 0x58a   : > { %v1069_v0 = vadd.f32 %v1066_v63, %v965_v61 }
 0x58c   : > { %v1074_v1 = vadd.f32 %v1421_v62, %v1069_v0 }
 0x58e   : > { %1075 = vst.msk [vmem:[%s561_s0] sm:$0xff] %vm573_vm0, %v1074_v1 }
 0x58f   : > { %1675 = shalt.err (!%p1672_p13)
}
 0x590   : > { %1322 = dma.vmem_to_hbm [thread:$0]  (%p1901_p2), %s1091_s7, 128, %s1093_s10, %s1077_s20  }
 0x591 PF: > { %s2160_s15 = sld [smem:[#allocation20_spill]]  ;;  %p1348_p0 = pnand %p1261_p6, %p1908_p7 }
 0x592   : > { %s2162_s22 = sld [smem:[#allocation22_spill]] }
 0x593   : > { %p1349_p4 = pneg %p1348_p0 }
 0x597   : > { %s1104_s1 = sand.u32 1, %s2160_s15  }
 0x598   : > { %s1105_s13 = scalar_lea.sflag [#allocation4], %s1104_s1 }
 0x599   : > { %1717 = dma.done.wait (%p1349_p4), %s1105_s13, 128  }
 0x59a   : > { %1719 = vsyncadd (%p1349_p4), %s1105_s13, 4294967168  ;;  %s32_s22 = sadd.s32 1, %s2162_s22   ;;  %s2163_s24 = sld [smem:[#allocation25_spill]] }
 0x59b   : > { %p29_p9 = scmp.ge.s32.totalorder %s32_s22, 4   ;;  %s2164_s20 = sld [smem:[#allocation21_spill]] }
 0x59c   : > { %s2165_s21 = sld [smem:[#allocation23_spill]]  ;;  %s2166_s17 = smov %s1726_s18 }
 0x59d   : > { %s2167_s18 = smov %s1730_s19  ;;  %31 = sbr.rel (!%p29_p9) target bundleno = 18 (0x12), region = 149 }
 0x5a0   : > { %s2168_s19 = smov %s2163_s24 }
 0x5a2   :  { %1111 = vsyncpa [#allocation3], 1 }
 0x5a3   :  { %1113 = vsyncpa [#allocation3 + $0x1], 1 }
 0x5a4   :  { %1114 = vsyncpa [#allocation6], 1 }
 0x5a5   :  { %1116 = vsyncpa [#allocation6 + $0x1], 1 }
 0x5a6   :  { %1117 = vsyncpa [#allocation9], 1 }
 0x5a7   :  { %1118 = vsyncpa [#allocation12], 1 }
 0x5a8   :  { %1119 = vsyncpa [#allocation4], 1 }
 0x5a9   :  { %1121 = vsyncpa [#allocation4 + $0x1], 1 }

</bundles_post_ra>
